<compile_context>
chip_gen: v7x
topology: tpu7x:2x2x1
jax: 0.10.0
libtpu: 0.0.40
codegen_flags: <defaults>
</compile_context>

<pallas_src>
import functools

import jax
import jax.numpy as jnp
from jax.experimental import pallas as pl
from jax.experimental.pallas import tpu as pltpu

LANES = 128
MAX_BLOCK_ROWS = 2048   # multiple of 32 -> legal sublane tiling for 1/2/4-byte dtypes
NUM_CORES = 2           # v7x: 2 TensorCores; on v5e/v6e the extra axis is a cheap serial loop


def _apply_activation(x, activation, activation_params):
    """Optional activation, mirroring `getattr(torch, activation)(x, **params)`."""
    if activation is None:
        return x
    params = activation_params or {}
    if callable(activation):               # user passed a JAX-traceable callable
        return activation(x, **params)
    if activation == "sigmoid":
        return jax.nn.sigmoid(x)
    if activation == "tanh":
        return jnp.tanh(x)
    if activation == "relu":
        return jnp.maximum(x, 0.0)
    if activation == "exp":
        return jnp.exp(x)
    if activation == "abs":
        return jnp.abs(x)
    if activation == "clamp":
        return jnp.clip(x, params.get("min"), params.get("max"))
    # TODO(synk): only a small set of torch.* activations is mapped here.
    raise ValueError(f"unsupported activation: {activation}")


def _avg_kernel(x_ref, o_ref, acc_ref, *, n_rows, tr, bpc,
                activation, activation_params):
    c = pl.program_id(0)   # core split ("parallel")
    i = pl.program_id(1)   # row-block stream ("arbitrary")

    @pl.when(i == 0)
    def _init():
        acc_ref[...] = jnp.zeros_like(acc_ref)

    x = x_ref[...].astype(jnp.float32)     # upcast in-kernel; DMA stays native dtype
    x = _apply_activation(x, activation, activation_params)

    # Row-relative bounds (avoids 32-bit flat-index overflow).  Only boundary /
    # padded blocks ever take the masked path; the streaming path is one VPU
    # add per vreg.
    start_row = (c * bpc + i) * tr

    @pl.when(start_row + tr <= n_rows)
    def _fast():
        acc_ref[...] = acc_ref[...] + x

    @pl.when(start_row + tr > n_rows)
    def _masked():
        row_idx = jax.lax.broadcasted_iota(jnp.int32, x.shape, 0)
        valid = (start_row + row_idx) < n_rows
        acc_ref[...] = acc_ref[...] + jnp.where(valid, x, jnp.float32(0.0))

    @pl.when(i == pl.num_programs(1) - 1)
    def _finalize():
        # Single cross-sublane reduce per core, off the hot path.
        o_ref[0] = jnp.sum(acc_ref[...], axis=0, keepdims=True)


def _row_block_size(n_rows, itemsize):
    """Largest legal row-block (multiple of the dtype's sublane tile), <= MAX_BLOCK_ROWS."""
    sub = {4: 8, 2: 16, 1: 32}.get(itemsize, 8)
    if n_rows >= MAX_BLOCK_ROWS:
        return MAX_BLOCK_ROWS
    if n_rows < sub or n_rows % sub == 0:
        return n_rows                      # single block exactly covering the array
    return (n_rows // sub) * sub           # full blocks + one masked partial block


def average_value(tensor, activation=None, activation_params=None):
    """Pallas equivalent of AverageValue.forward: mean(activation(tensor))."""
    activation_params = activation_params or {}
    tensor = jnp.asarray(tensor)
    n_elems = tensor.size
    if n_elems == 0:
        return jnp.float32(jnp.nan)        # matches torch.mean of an empty tensor

    flat = tensor.reshape(-1)              # free (bitcast), keeps native dtype
    n_rows = n_elems // LANES
    rem = n_elems - n_rows * LANES

    tail_sum = jnp.float32(0.0)
    if rem:
        # < 128 leftover elements: reduce them with plain XLA in the wrapper.
        tail = flat[n_rows * LANES:].astype(jnp.float32)
        tail_sum = jnp.sum(_apply_activation(tail, activation, activation_params))

    kernel_sum = jnp.float32(0.0)
    if n_rows:
        main = flat if rem == 0 else flat[: n_rows * LANES]
        # TODO(synk): when n_elems % 128 != 0 the slice above materializes one
        # extra copy of the main body; fully copy-free would need manual DMA
        # from the ND input.
        x2d = main.reshape(n_rows, LANES)  # free (bitcast) for a contiguous input

        tr = _row_block_size(n_rows, tensor.dtype.itemsize)
        blocks_total = pl.cdiv(n_rows, tr)
        nc = NUM_CORES if blocks_total >= NUM_CORES else 1
        bpc = pl.cdiv(blocks_total, nc)    # blocks per core (extra ones clamped+masked)

        kernel = functools.partial(
            _avg_kernel, n_rows=n_rows, tr=tr, bpc=bpc,
            activation=activation, activation_params=activation_params)

        partials = pl.pallas_call(
            kernel,
            out_shape=jax.ShapeDtypeStruct((nc, 1, LANES), jnp.float32),
            grid_spec=pltpu.PrefetchScalarGridSpec(
                num_scalar_prefetch=0,
                grid=(nc, bpc),
                in_specs=[pl.BlockSpec(
                    (tr, LANES),
                    lambda c, i: (jnp.minimum(c * bpc + i, blocks_total - 1), 0))],
                out_specs=pl.BlockSpec((1, 1, LANES), lambda c, i: (c, 0, 0)),
                scratch_shapes=[pltpu.VMEM((tr, LANES), jnp.float32)],
            ),
            compiler_params=pltpu.CompilerParams(
                dimension_semantics=("parallel", "arbitrary")),
        )(x2d)
        kernel_sum = jnp.sum(partials)

    return (kernel_sum + tail_sum) / jnp.float32(n_elems)


if __name__ == "__main__":
    key = jax.random.PRNGKey(0)
    k0, k1 = jax.random.split(key)

    # NCHW input consistent with the GAN-metric use case.
    x = jax.random.normal(k0, (2, 4, 16, 16), dtype=jnp.float32)

    # activation=None (module default): plain global mean.
    out = average_value(x)
    jax.block_until_ready(out)
    ref = jnp.mean(x)
    assert jnp.allclose(out, ref, atol=1e-5, rtol=1e-5), (out, ref)

    # activation="sigmoid" (torch.sigmoid then mean).
    out_sig = average_value(x, activation="sigmoid")
    jax.block_until_ready(out_sig)
    ref_sig = jnp.mean(jax.nn.sigmoid(x))
    assert jnp.allclose(out_sig, ref_sig, atol=1e-5, rtol=1e-5), (out_sig, ref_sig)

    # Odd shape: exercises the masked boundary block, the <128-element tail and
    # the 2-way core split -- all without any full-size padded copy.
    y = jax.random.normal(k1, (3, 5, 37, 23), dtype=jnp.float32)
    out_tanh = average_value(y, activation="tanh")
    jax.block_until_ready(out_tanh)
    ref_tanh = jnp.mean(jnp.tanh(y))
    assert jnp.allclose(out_tanh, ref_tanh, atol=1e-5, rtol=1e-5), (out_tanh, ref_tanh)

    print("KERNEL_OK")
</pallas_src>

<mosaic_0001>
module attributes {stable_mosaic.version = 11 : i64} {
  func.func @_avg_kernel(%arg0: i32, %arg1: i32, %arg2: memref<16x128xf32, #tpu.memory_space<vmem>>, %arg3: memref<1x1x128xf32, #tpu.memory_space<vmem>>, %arg4: memref<16x128xf32, #tpu.memory_space<vmem>>) attributes {dimension_semantics = [#tpu.dimension_semantics<parallel>, #tpu.dimension_semantics<arbitrary>], iteration_bounds = array<i64: 1, 1>, scalar_prefetch = 0 : i64, scratch_operands = 1 : i64, tpu.core_type = #tpu.core_type<tc>, window_params = [{transform_indices = @transform_0, window_bounds = array<i64: 16, 128>}, {transform_indices = @transform_1, window_bounds = array<i64: 1, 1, 128>}]} {
    %c0_i32 = arith.constant 0 : i32
    %0 = arith.cmpi eq, %arg1, %c0_i32 : i32
    %1 = arith.extui %0 : i1 to i32
    %c0_i32_0 = arith.constant 0 : i32
    %2 = arith.cmpi ne, %1, %c0_i32_0 : i32
    scf.if %2 {
      %cst = arith.constant 0.000000e+00 : f32
      %18 = vector.broadcast %cst : f32 to vector<16x128xf32>
      %c0_10 = arith.constant 0 : index
      %c0_11 = arith.constant 0 : index
      %19 = vector.load %arg4[%c0_10, %c0_11] : memref<16x128xf32, #tpu.memory_space<vmem>>, vector<16x128xf32>
      tpu.vector_store %arg4[%c0_10, %c0_11], %18 {strides = array<i32>} : memref<16x128xf32, #tpu.memory_space<vmem>>, vector<16x128xf32>,
    } else {
    }
    %c0 = arith.constant 0 : index
    %c0_1 = arith.constant 0 : index
    %3 = vector.load %arg2[%c0, %c0_1] : memref<16x128xf32, #tpu.memory_space<vmem>>, vector<16x128xf32>
    %c1_i32 = arith.constant 1 : i32
    %4 = arith.muli %arg0, %c1_i32 : i32
    %5 = arith.addi %4, %arg1 : i32
    %c16_i32 = arith.constant 16 : i32
    %6 = arith.muli %5, %c16_i32 : i32
    %c16_i32_2 = arith.constant 16 : i32
    %7 = arith.addi %6, %c16_i32_2 : i32
    %c16_i32_3 = arith.constant 16 : i32
    %8 = arith.cmpi sle, %7, %c16_i32_3 : i32
    %9 = arith.extui %8 : i1 to i32
    %c0_i32_4 = arith.constant 0 : i32
    %10 = arith.cmpi ne, %9, %c0_i32_4 : i32
    scf.if %10 {
      %c0_10 = arith.constant 0 : index
      %c0_11 = arith.constant 0 : index
      %18 = vector.load %arg4[%c0_10, %c0_11] : memref<16x128xf32, #tpu.memory_space<vmem>>, vector<16x128xf32>
      %19 = arith.addf %18, %3 : vector<16x128xf32>
      %c0_12 = arith.constant 0 : index
      %c0_13 = arith.constant 0 : index
      %20 = vector.load %arg4[%c0_12, %c0_13] : memref<16x128xf32, #tpu.memory_space<vmem>>, vector<16x128xf32>
      tpu.vector_store %arg4[%c0_12, %c0_13], %19 {strides = array<i32>} : memref<16x128xf32, #tpu.memory_space<vmem>>, vector<16x128xf32>,
    } else {
    }
    %c16_i32_5 = arith.constant 16 : i32
    %11 = arith.addi %6, %c16_i32_5 : i32
    %c16_i32_6 = arith.constant 16 : i32
    %12 = arith.cmpi sgt, %11, %c16_i32_6 : i32
    %13 = arith.extui %12 : i1 to i32
    %c0_i32_7 = arith.constant 0 : i32
    %14 = arith.cmpi ne, %13, %c0_i32_7 : i32
    scf.if %14 {
      %18 = tpu.iota {dimensions = array<i32: 0>} : vector<16x128xi32>
      %19 = vector.broadcast %6 : i32 to vector<16x128xi32>
      %20 = arith.addi %19, %18 : vector<16x128xi32>
      %c16_i32_10 = arith.constant 16 : i32
      %21 = vector.broadcast %c16_i32_10 : i32 to vector<16x128xi32>
      %22 = arith.cmpi slt, %20, %21 : vector<16x128xi32>
      %c0_11 = arith.constant 0 : index
      %c0_12 = arith.constant 0 : index
      %23 = vector.load %arg4[%c0_11, %c0_12] : memref<16x128xf32, #tpu.memory_space<vmem>>, vector<16x128xf32>
      %cst = arith.constant 0.000000e+00 : f32
      %24 = vector.broadcast %cst : f32 to vector<16x128xf32>
      %25 = arith.select %22, %3, %24 : vector<16x128xi1>, vector<16x128xf32>
      %26 = arith.addf %23, %25 : vector<16x128xf32>
      %c0_13 = arith.constant 0 : index
      %c0_14 = arith.constant 0 : index
      %27 = vector.load %arg4[%c0_13, %c0_14] : memref<16x128xf32, #tpu.memory_space<vmem>>, vector<16x128xf32>
      tpu.vector_store %arg4[%c0_13, %c0_14], %26 {strides = array<i32>} : memref<16x128xf32, #tpu.memory_space<vmem>>, vector<16x128xf32>,
    } else {
    }
    %c0_i32_8 = arith.constant 0 : i32
    %15 = arith.cmpi eq, %arg1, %c0_i32_8 : i32
    %16 = arith.extui %15 : i1 to i32
    %c0_i32_9 = arith.constant 0 : i32
    %17 = arith.cmpi ne, %16, %c0_i32_9 : i32
    scf.if %17 {
      %c0_10 = arith.constant 0 : index
      %c0_11 = arith.constant 0 : index
      %18 = vector.load %arg4[%c0_10, %c0_11] : memref<16x128xf32, #tpu.memory_space<vmem>>, vector<16x128xf32>
      %cst = arith.constant dense<0.000000e+00> : vector<128xf32>
      %19 = vector.multi_reduction <add>, %18, %cst [0] : vector<16x128xf32> to vector<128xf32>
      %20 = vector.shape_cast %19 : vector<128xf32> to vector<1x128xf32>
      %c0_12 = arith.constant 0 : index
      %c0_13 = arith.constant 0 : index
      %c0_14 = arith.constant 0 : index
      %21 = vector.load %arg3[%c0_12, %c0_13, %c0_14] : memref<1x1x128xf32, #tpu.memory_space<vmem>>, vector<1x1x128xf32>
      %22 = vector.shape_cast %21 : vector<1x1x128xf32> to vector<1x128xf32>
      %23 = vector.shape_cast %20 : vector<1x128xf32> to vector<1x1x128xf32>
      tpu.vector_store %arg3[%c0_12, %c0_13, %c0_14], %23 {strides = array<i32>} : memref<1x1x128xf32, #tpu.memory_space<vmem>>, vector<1x1x128xf32>,
    } else {
    }
    return
  }
  func.func @transform_0(%arg0: i32, %arg1: i32) -> (i32, i32) {
    %c1_i32 = arith.constant 1 : i32
    %0 = arith.muli %arg0, %c1_i32 : i32
    %1 = arith.addi %0, %arg1 : i32
    %c0_i32 = arith.constant 0 : i32
    %2 = arith.minsi %1, %c0_i32 : i32
    %c0_i32_0 = arith.constant 0 : i32
    %c0_i32_1 = arith.constant 0 : i32
    return %2, %c0_i32_0 : i32, i32
  }
  func.func @transform_1(%arg0: i32, %arg1: i32) -> (i32, i32, i32) {
    %c0_i32 = arith.constant 0 : i32
    %c0_i32_0 = arith.constant 0 : i32
    %c0_i32_1 = arith.constant 0 : i32
    return %arg0, %c0_i32, %c0_i32_0 : i32, i32, i32
  }
}

</mosaic_0001>

<bundles_post_ra>
// kernel: tpu_custom_call.1
= control target key start
LH: loop header
LB: loop body
LE: loop exit
PB: predicated region body
PF: predicated region fallthrough
CT: control target
= control target key end

     0   :  { %6 = vsyncpa [#allocation4], 0  ;;  %s194_s0 = inlined_call_operand.hbm [shape: f32[16,128], index: 0, kind: input, shape index: {}]   ;;  %s195_s1 = inlined_call_operand.hbm [shape: f32[1,1,128], index: 1, kind: output, shape index: {}]  }
   0x1   :  { %7 = vsyncpa [#allocation5], 0  ;;  %s156_s6 = smov [#allocation3]   ;;  %s108_s10 = scalar_lea.hbm %s194_s0, 256 }
   0x2   :  { %s19_s7 = sshll.u32 %s156_s6, 4  ;;  %p109_p0 = scmp.ne.s32.totalorder %s194_s0, %s108_s10  ;;  %s20_s7 = int_to_ptr.vmem [resolvable:$true] %s19_s7 }
   0x3   :  { %p112_p1 = scmp.lt.u32.totalorder %s108_s10, %s194_s0 }
   0x5   :  { %p114_p2 = pnand %p112_p1, %p109_p0 }
   0x7   :  { %117 = shalt.err (!%p114_p2)
}
   0x8   :  { %s118_s15 = scalar_lea.vmem %s20_s7, 256  ;;  %p123_p4 = scmp.lt.s32.totalorder %s20_s7, %s20_s7 }
   0x9   :  { %p119_p3 = scmp.ne.s32.totalorder %s20_s7, %s118_s15  ;;  %p124_p5 = scmp.lt.s32.totalorder %s118_s15, %s118_s15 }
   0xb   :  { %p125_p6 = por %p124_p5, %p123_p4 }
   0xd   :  { %p126_p7 = pnand %p125_p6, %p119_p3 }
   0xf   :  { %129 = shalt.err (!%p126_p7)
}
  0x10   :  { %s157_s16 = smov 128   ;;  %s158_s17 = smov 8  }
  0x11   :  { %25 = dma.hbm_to_vmem [thread:$0]  %s194_s0, 256, %s20_s7, [#allocation4], %s157_s16, %s157_s16, %s158_s17  }
  0x12   :  { %152 = dma.done.wait [#allocation4], 256  }
  0x13   :  { %153 = vsyncadd [#allocation4], 4294967040  ;;  %v39_v0 = vld [vmem:[#allocation3] sm:$0xff]  ;;  %v40_v1 = vld [vmem:[#allocation3 + $0x8] sm:$0xff]  ;;  %s159_s20 = smov [#allocation6]  }
  0x14   :  { %v79_v2 = vadd.f32 %v40_v1, %v39_v0  ;;  %s93_s21 = sshll.u32 %s159_s20, 4  ;;  %s94_s21 = int_to_ptr.vmem [resolvable:$true] %s93_s21 }
  0x15   :  { %s130_s22 = scalar_lea.vmem %s94_s21, 16  ;;  %s134_s23 = scalar_lea.vmem %s94_s21, 32 }
  0x16   :  { %v80_v3 = vrot.slane %v79_v2, 4  ;;  %p131_p8 = scmp.ne.s32.totalorder %s94_s21, %s130_s22  ;;  %p135_p9 = scmp.lt.s32.totalorder %s94_s21, %s94_s21 }
  0x17   :  { %p136_p10 = scmp.lt.s32.totalorder %s134_s23, %s130_s22 }
  0x18   :  { %v81_v4 = vadd.f32 %v80_v3, %v79_v2 }
  0x19   :  { %p137_p11 = por %p136_p10, %p135_p9 }
  0x1a   :  { %v82_v5 = vrot.slane %v81_v4, 2 }
  0x1b   :  { %p138_p12 = pnand %p137_p11, %p131_p8 }
  0x1c   :  { %v83_v6 = vadd.f32 %v82_v5, %v81_v4 }
  0x1e   :  { %v84_v7 = vrot.slane %v83_v6, 1 }
  0x20   :  { %v85_v8 = vadd.f32 %v84_v7, %v83_v6 }
  0x22   :  { %86 = vst [vmem:[#allocation6] sm:$0x1] %v85_v8 }
  0x23   :  { %141 = shalt.err (!%p138_p12)
}
  0x24   :  { %s142_s25 = scalar_lea.hbm %s195_s1, 16 }
  0x25   :  { %p143_p13 = scmp.ne.s32.totalorder %s195_s1, %s142_s25  ;;  %p146_p0 = scmp.lt.u32.totalorder %s142_s25, %s195_s1 }
  0x27   :  { %p148_p1 = pnand %p146_p0, %p143_p13 }
  0x29   :  { %151 = shalt.err (!%p148_p1)
}
  0x2a   :  { %96 = dma.vmem_to_hbm [thread:$0]  %s94_s21, 16, %s195_s1, [#allocation5]  }
  0x2b   :  { %154 = dma.done.wait [#allocation5], 16  }
  0x2c   :  { %155 = vsyncadd [#allocation5], 4294967280 }
  0x2d   :  { %100 = vsyncpa [#allocation4], 1 }
  0x2e   :  { %101 = vsyncpa [#allocation5], 1 }

</bundles_post_ra>
